<compile_context>
chip_gen: v5e
topology: v5e:2x2
jax: 0.10.0
libtpu: 0.0.40
codegen_flags: <defaults>
</compile_context>

<pallas_src>
import functools

import jax
import jax.numpy as jnp
from jax.experimental import pallas as pl
from jax.experimental.pallas import tpu as pltpu


def _round_up(x, m):
    return (x + m - 1) // m * m


# ----------------------------- Pallas kernel --------------------------------
def _q_rnn_seq_kernel(x_ref, h0_ref, w1_ref, wg_ref, w2_ref, b_ref,
                      q_ref, hout_ref, h_scr, *, hp):
    """One grid step == one RNN timestep. Weights are VMEM-resident blocks."""
    t = pl.program_id(0)
    HP = hp                                     # padded hidden dim (mult of 128)
    AP = b_ref.shape[1] - 5 * HP                # padded action dim

    # Initialize the hidden-state carry from h0 on the first step only.
    @pl.when(t == 0)
    def _():
        h_scr[...] = h0_ref[...]

    # Concatenated biases: [b1 | b_r | b_z | b_in | b_hn | b2], all 128-aligned.
    b1 = b_ref[:, 0:HP]                         # (1, HP)
    bg = b_ref[:, HP:5 * HP]                    # (1, 4*HP)
    b2 = b_ref[:, 5 * HP:5 * HP + AP]           # (1, AP)

    x = x_ref[0]                                # (Bp, IP)
    h = h_scr[...]                              # (Bp, HP)

    # ---- fc1 + ReLU ---------------------------------------------------------
    x1 = jnp.maximum(
        jnp.dot(x, w1_ref[...], preferred_element_type=jnp.float32) + b1, 0.0)

    # ---- GRUCell: single fused MXU dot over [x1, h] -------------------------
    xh = jnp.concatenate([x1, h], axis=-1)      # (Bp, 2*HP), 128-aligned concat
    g = jnp.dot(xh, wg_ref[...], preferred_element_type=jnp.float32) + bg  # (Bp, 4*HP)

    r = jax.nn.sigmoid(g[:, 0 * HP:1 * HP])
    z = jax.nn.sigmoid(g[:, 1 * HP:2 * HP])
    n = jnp.tanh(g[:, 2 * HP:3 * HP] + r * g[:, 3 * HP:4 * HP])
    h_new = (1.0 - z) * n + z * h               # (Bp, HP), f32 throughout

    # ---- fc2 ----------------------------------------------------------------
    q = jnp.dot(h_new, w2_ref[...], preferred_element_type=jnp.float32) + b2

    q_ref[0] = q                                # lane-dense (Bp, AP) store
    hout_ref[...] = h_new                       # resident block, flushed at end
    h_scr[...] = h_new                          # carry to next timestep


# ------------------------------ wrappers -------------------------------------
def q_network_rnn_rollout(x_seq, h0, packed):
    """Runs T GRU steps in a single pallas_call. Returns (Q[T,B,A], h_T[B,H])."""
    I, H, A, IP, HP, AP = packed["dims"]
    T, B, _ = x_seq.shape
    Bp = _round_up(B, 8)

    xp = jnp.zeros((T, Bp, IP), jnp.float32).at[:, :B, :I].set(x_seq)
    hp0 = jnp.zeros((Bp, HP), jnp.float32).at[:B, :H].set(h0)

    kernel = functools.partial(_q_rnn_seq_kernel, hp=HP)

    q_pad, h_pad = pl.pallas_call(
        kernel,
        out_shape=(
            jax.ShapeDtypeStruct((T, Bp, AP), jnp.float32),
            jax.ShapeDtypeStruct((Bp, HP), jnp.float32),
        ),
        grid_spec=pltpu.PrefetchScalarGridSpec(
            num_scalar_prefetch=0,
            grid=(T,),
            in_specs=[
                # per-step input slice
                pl.BlockSpec((1, Bp, IP), lambda t: (t, 0, 0)),
                # initial hidden state (resident)
                pl.BlockSpec((Bp, HP), lambda t: (0, 0)),
                # weights / fused bias: constant index -> stay in VMEM, no re-DMA
                pl.BlockSpec((IP, HP), lambda t: (0, 0)),
                pl.BlockSpec((2 * HP, 4 * HP), lambda t: (0, 0)),
                pl.BlockSpec((HP, AP), lambda t: (0, 0)),
                pl.BlockSpec((1, 5 * HP + AP), lambda t: (0, 0)),
            ],
            out_specs=(
                pl.BlockSpec((1, Bp, AP), lambda t: (t, 0, 0)),
                pl.BlockSpec((Bp, HP), lambda t: (0, 0)),
            ),
            scratch_shapes=[pltpu.VMEM((Bp, HP), jnp.float32)],
        ),
        # T axis carries the hidden state -> sequential. (A batch "parallel"
        # axis for v7x megacore only pays off at much larger B.)
        compiler_params=pltpu.CompilerParams(
            dimension_semantics=("arbitrary",)),
    )(xp, hp0, packed["w1"], packed["wg"], packed["w2"], packed["b"])

    return q_pad[:, :B, :A], h_pad[:B, :H]


def q_network_rnn_forward(x, h, packed):
    """Module-style single step: Q = fc2(GRU(relu(fc1(x)), h)). Returns (Q, h')."""
    q_seq, h_new = q_network_rnn_rollout(x[None], h, packed)
    return q_seq[0], h_new


# --------------------- parameter init / packing ------------------------------
def _orthogonal(key, rows, cols, gain=1.0, dtype=jnp.float32):
    # Mirrors nn.init.orthogonal_ on a (rows, cols) weight.
    n = max(rows, cols)
    a = jax.random.normal(key, (n, min(rows, cols)), dtype=jnp.float32)
    q_mat, r_mat = jnp.linalg.qr(a)
    q_mat = q_mat * jnp.sign(jnp.diagonal(r_mat))
    w = q_mat[:rows, :cols] if rows >= cols else q_mat[:cols, :rows].T
    return (gain * w).astype(dtype)


def init_params(key, input_dim, hidden_dim, action_dim):
    """Raw params in [in, out] layout (transposed vs PyTorch), zero biases
    (matches orthogonal_init)."""
    k1, k2, k3, k4 = jax.random.split(key, 4)
    return {
        "w1": _orthogonal(k1, hidden_dim, input_dim).T,          # (I, H)
        "b1": jnp.zeros((hidden_dim,), jnp.float32),
        "w_ih": _orthogonal(k2, 3 * hidden_dim, hidden_dim).T,   # (H, 3H) gates r,z,n
        "b_ih": jnp.zeros((3 * hidden_dim,), jnp.float32),
        "w_hh": _orthogonal(k3, 3 * hidden_dim, hidden_dim).T,   # (H, 3H)
        "b_hh": jnp.zeros((3 * hidden_dim,), jnp.float32),
        "w2": _orthogonal(k4, action_dim, hidden_dim).T,         # (H, A)
        "b2": jnp.zeros((action_dim,), jnp.float32),
    }


def pack_params(raw, input_dim, hidden_dim, action_dim):
    """Pads features to 128 lanes and packs the GRU into one fused weight:
    columns = [r | z | n_x | n_h], each a 128-lane-aligned block."""
    I, H, A = input_dim, hidden_dim, action_dim
    IP, HP, AP = _round_up(I, 128), _round_up(H, 128), _round_up(A, 128)

    w1 = jnp.zeros((IP, HP), jnp.float32).at[:I, :H].set(raw["w1"])
    w2 = jnp.zeros((HP, AP), jnp.float32).at[:H, :A].set(raw["w2"])

    w_ih, w_hh = raw["w_ih"], raw["w_hh"]
    wg = jnp.zeros((2 * HP, 4 * HP), jnp.float32)
    # r gate (input rows 0:H, hidden rows HP:HP+H)
    wg = wg.at[:H, 0 * HP:0 * HP + H].set(w_ih[:, 0:H])
    wg = wg.at[HP:HP + H, 0 * HP:0 * HP + H].set(w_hh[:, 0:H])
    # z gate
    wg = wg.at[:H, 1 * HP:1 * HP + H].set(w_ih[:, H:2 * H])
    wg = wg.at[HP:HP + H, 1 * HP:1 * HP + H].set(w_hh[:, H:2 * H])
    # n gate, x-part
    wg = wg.at[:H, 2 * HP:2 * HP + H].set(w_ih[:, 2 * H:3 * H])
    # n gate, h-part (kept separate so r gates it)
    wg = wg.at[HP:HP + H, 3 * HP:3 * HP + H].set(w_hh[:, 2 * H:3 * H])

    b = jnp.zeros((1, 5 * HP + AP), jnp.float32)
    b = b.at[0, 0:H].set(raw["b1"])
    b = b.at[0, 1 * HP:1 * HP + H].set(raw["b_ih"][0:H] + raw["b_hh"][0:H])
    b = b.at[0, 2 * HP:2 * HP + H].set(raw["b_ih"][H:2 * H] + raw["b_hh"][H:2 * H])
    b = b.at[0, 3 * HP:3 * HP + H].set(raw["b_ih"][2 * H:3 * H])
    b = b.at[0, 4 * HP:4 * HP + H].set(raw["b_hh"][2 * H:3 * H])
    b = b.at[0, 5 * HP:5 * HP + A].set(raw["b2"])

    return {"w1": w1, "wg": wg, "w2": w2, "b": b, "dims": (I, H, A, IP, HP, AP)}


# --------------------------- pure-JAX reference -------------------------------
def reference_rollout(x_seq, h0, raw):
    H = h0.shape[-1]
    hi = jax.lax.Precision.HIGHEST

    def step(h, x):
        x1 = jax.nn.relu(jnp.dot(x, raw["w1"], precision=hi) + raw["b1"])
        gi = jnp.dot(x1, raw["w_ih"], precision=hi) + raw["b_ih"]
        gh = jnp.dot(h, raw["w_hh"], precision=hi) + raw["b_hh"]
        r = jax.nn.sigmoid(gi[:, :H] + gh[:, :H])
        z = jax.nn.sigmoid(gi[:, H:2 * H] + gh[:, H:2 * H])
        n = jnp.tanh(gi[:, 2 * H:] + r * gh[:, 2 * H:])
        h_new = (1.0 - z) * n + z * h
        q = jnp.dot(h_new, raw["w2"], precision=hi) + raw["b2"]
        return h_new, q

    h_final, q_seq = jax.lax.scan(step, h0, x_seq)
    return q_seq, h_final


# ----------------------------------- demo ------------------------------------
if __name__ == "__main__":
    T = 8               # rollout length (episode_limit steps)
    batch = 8           # multiple of 8 sublanes
    input_dim = 32      # per-agent obs(+id+last-action) dim
    hidden_dim = 32     # args.rnn_hidden_dim
    action_dim = 16     # args.action_dim

    key = jax.random.PRNGKey(0)
    k_x, k_p, k_b = jax.random.split(key, 3)

    raw = init_params(k_p, input_dim, hidden_dim, action_dim)
    # Non-zero biases (the module's Linear/GRUCell have bias params; randomizing
    # them here exercises the fused-bias packing path in the check).
    bk = jax.random.split(k_b, 4)
    raw["b1"] = 0.1 * jax.random.normal(bk[0], (hidden_dim,), jnp.float32)
    raw["b_ih"] = 0.1 * jax.random.normal(bk[1], (3 * hidden_dim,), jnp.float32)
    raw["b_hh"] = 0.1 * jax.random.normal(bk[2], (3 * hidden_dim,), jnp.float32)
    raw["b2"] = 0.1 * jax.random.normal(bk[3], (action_dim,), jnp.float32)

    packed = pack_params(raw, input_dim, hidden_dim, action_dim)

    x_seq = jax.random.normal(k_x, (T, batch, input_dim), dtype=jnp.float32)
    h0 = jnp.zeros((batch, hidden_dim), jnp.float32)   # rnn_hidden = None -> zeros

    q_seq, h_final = q_network_rnn_rollout(x_seq, h0, packed)
    jax.block_until_ready((q_seq, h_final))

    q_ref, h_ref = reference_rollout(x_seq, h0, raw)

    assert q_seq.shape == (T, batch, action_dim)
    assert h_final.shape == (batch, hidden_dim)
    assert jnp.allclose(q_seq, q_ref, atol=1e-3, rtol=1e-3), \
        float(jnp.max(jnp.abs(q_seq - q_ref)))
    assert jnp.allclose(h_final, h_ref, atol=1e-3, rtol=1e-3)

    # Module-style single-step forward also works (T=1 rollout).
    q1, h1 = q_network_rnn_forward(x_seq[0], h0, packed)
    jax.block_until_ready((q1, h1))

    print("KERNEL_OK")
</pallas_src>

<mosaic_0001>
module attributes {stable_mosaic.version = 11 : i64} {
  func.func @_q_rnn_seq_kernel(%arg0: i32, %arg1: memref<1x8x128xf32, #tpu.memory_space<vmem>>, %arg2: memref<8x128xf32, #tpu.memory_space<vmem>>, %arg3: memref<128x128xf32, #tpu.memory_space<vmem>>, %arg4: memref<256x512xf32, #tpu.memory_space<vmem>>, %arg5: memref<128x128xf32, #tpu.memory_space<vmem>>, %arg6: memref<1x768xf32, #tpu.memory_space<vmem>>, %arg7: memref<1x8x128xf32, #tpu.memory_space<vmem>>, %arg8: memref<8x128xf32, #tpu.memory_space<vmem>>, %arg9: memref<8x128xf32, #tpu.memory_space<vmem>>) attributes {dimension_semantics = [#tpu.dimension_semantics<arbitrary>], iteration_bounds = array<i64: 8>, scalar_prefetch = 0 : i64, scratch_operands = 1 : i64, tpu.core_type = #tpu.core_type<tc>, window_params = [{transform_indices = @transform_0, window_bounds = array<i64: 1, 8, 128>}, {pipeline_mode = #tpu.pipeline_mode<synchronous>, transform_indices = @transform_1, window_bounds = array<i64: 8, 128>}, {pipeline_mode = #tpu.pipeline_mode<synchronous>, transform_indices = @transform_2, window_bounds = array<i64: 128, 128>}, {pipeline_mode = #tpu.pipeline_mode<synchronous>, transform_indices = @transform_3, window_bounds = array<i64: 256, 512>}, {pipeline_mode = #tpu.pipeline_mode<synchronous>, transform_indices = @transform_4, window_bounds = array<i64: 128, 128>}, {pipeline_mode = #tpu.pipeline_mode<synchronous>, transform_indices = @transform_5, window_bounds = array<i64: 1, 768>}, {transform_indices = @transform_6, window_bounds = array<i64: 1, 8, 128>}, {pipeline_mode = #tpu.pipeline_mode<synchronous>, transform_indices = @transform_7, window_bounds = array<i64: 8, 128>}]} {
    %c0_i32 = arith.constant 0 : i32
    %0 = arith.cmpi eq, %arg0, %c0_i32 : i32
    %1 = arith.extui %0 : i1 to i32
    %c0_i32_0 = arith.constant 0 : i32
    %2 = arith.cmpi ne, %1, %c0_i32_0 : i32
    scf.if %2 {
      %c0_28 = arith.constant 0 : index
      %c0_29 = arith.constant 0 : index
      %51 = vector.load %arg2[%c0_28, %c0_29] : memref<8x128xf32, #tpu.memory_space<vmem>>, vector<8x128xf32>
      %c0_30 = arith.constant 0 : index
      %c0_31 = arith.constant 0 : index
      %52 = vector.load %arg9[%c0_30, %c0_31] : memref<8x128xf32, #tpu.memory_space<vmem>>, vector<8x128xf32>
      tpu.vector_store %arg9[%c0_30, %c0_31], %51 {strides = array<i32>} : memref<8x128xf32, #tpu.memory_space<vmem>>, vector<8x128xf32>,
    } else {
    }
    %c0 = arith.constant 0 : index
    %c0_1 = arith.constant 0 : index
    %3 = vector.load %arg6[%c0, %c0_1] : memref<1x768xf32, #tpu.memory_space<vmem>>, vector<1x128xf32>
    %c0_2 = arith.constant 0 : index
    %c128 = arith.constant 128 : index
    %4 = vector.load %arg6[%c0_2, %c128] : memref<1x768xf32, #tpu.memory_space<vmem>>, vector<1x512xf32>
    %c0_3 = arith.constant 0 : index
    %c640 = arith.constant 640 : index
    %5 = vector.load %arg6[%c0_3, %c640] : memref<1x768xf32, #tpu.memory_space<vmem>>, vector<1x128xf32>
    %c0_4 = arith.constant 0 : index
    %c0_5 = arith.constant 0 : index
    %c0_6 = arith.constant 0 : index
    %6 = vector.load %arg1[%c0_4, %c0_5, %c0_6] : memref<1x8x128xf32, #tpu.memory_space<vmem>>, vector<1x8x128xf32>
    %7 = vector.shape_cast %6 : vector<1x8x128xf32> to vector<8x128xf32>
    %c0_7 = arith.constant 0 : index
    %c0_8 = arith.constant 0 : index
    %8 = vector.load %arg9[%c0_7, %c0_8] : memref<8x128xf32, #tpu.memory_space<vmem>>, vector<8x128xf32>
    %c0_9 = arith.constant 0 : index
    %c0_10 = arith.constant 0 : index
    %9 = vector.load %arg3[%c0_9, %c0_10] : memref<128x128xf32, #tpu.memory_space<vmem>>, vector<128x128xf32>
    %cst = arith.constant dense<0.000000e+00> : vector<8x128xf32>
    %10 = tpu.matmul %7, %9, %cst {dimension_numbers = #tpu.dot_dimension_numbers<[1], [0], [0], [1], [0, 0, 1, 1], [], []>} : vector<8x128xf32>, vector<128x128xf32>, vector<8x128xf32> -> vector<8x128xf32>
    %11 = vector.broadcast %3 : vector<1x128xf32> to vector<8x128xf32>
    %12 = arith.addf %10, %11 : vector<8x128xf32>
    %cst_11 = arith.constant 0.000000e+00 : f32
    %13 = vector.broadcast %cst_11 : f32 to vector<8x128xf32>
    %14 = arith.maximumf %12, %13 : vector<8x128xf32>
    %15 = tpu.concatenate %14, %8 in 1 : vector<8x128xf32>, vector<8x128xf32> -> vector<8x256xf32>
    %c0_12 = arith.constant 0 : index
    %c0_13 = arith.constant 0 : index
    %16 = vector.load %arg4[%c0_12, %c0_13] : memref<256x512xf32, #tpu.memory_space<vmem>>, vector<256x512xf32>
    %cst_14 = arith.constant dense<0.000000e+00> : vector<8x512xf32>
    %17 = tpu.matmul %15, %16, %cst_14 {dimension_numbers = #tpu.dot_dimension_numbers<[1], [0], [0], [1], [0, 0, 1, 1], [], []>} : vector<8x256xf32>, vector<256x512xf32>, vector<8x512xf32> -> vector<8x512xf32>
    %18 = vector.broadcast %4 : vector<1x512xf32> to vector<8x512xf32>
    %19 = arith.addf %17, %18 : vector<8x512xf32>
    %20 = vector.extract_strided_slice %19 {offsets = [0, 0], sizes = [8, 128], strides = [1, 1]} : vector<8x512xf32> to vector<8x128xf32>
    %21 = arith.negf %20 : vector<8x128xf32>
    %22 = math.exp %21 : vector<8x128xf32>
    %cst_15 = arith.constant 1.000000e+00 : f32
    %23 = vector.broadcast %cst_15 : f32 to vector<8x128xf32>
    %24 = arith.addf %23, %22 : vector<8x128xf32>
    %25 = arith.divf %23, %24 : vector<8x128xf32>
    %26 = vector.extract_strided_slice %19 {offsets = [0, 128], sizes = [8, 128], strides = [1, 1]} : vector<8x512xf32> to vector<8x128xf32>
    %27 = arith.negf %26 : vector<8x128xf32>
    %28 = math.exp %27 : vector<8x128xf32>
    %cst_16 = arith.constant 1.000000e+00 : f32
    %29 = vector.broadcast %cst_16 : f32 to vector<8x128xf32>
    %30 = arith.addf %29, %28 : vector<8x128xf32>
    %31 = arith.divf %29, %30 : vector<8x128xf32>
    %32 = vector.extract_strided_slice %19 {offsets = [0, 256], sizes = [8, 128], strides = [1, 1]} : vector<8x512xf32> to vector<8x128xf32>
    %33 = vector.extract_strided_slice %19 {offsets = [0, 384], sizes = [8, 128], strides = [1, 1]} : vector<8x512xf32> to vector<8x128xf32>
    %34 = arith.mulf %25, %33 : vector<8x128xf32>
    %35 = arith.addf %32, %34 : vector<8x128xf32>
    %36 = math.tanh %35 : vector<8x128xf32>
    %cst_17 = arith.constant 1.000000e+00 : f32
    %37 = vector.broadcast %cst_17 : f32 to vector<8x128xf32>
    %38 = arith.subf %37, %31 : vector<8x128xf32>
    %39 = arith.mulf %38, %36 : vector<8x128xf32>
    %40 = arith.mulf %31, %8 : vector<8x128xf32>
    %41 = arith.addf %39, %40 : vector<8x128xf32>
    %c0_18 = arith.constant 0 : index
    %c0_19 = arith.constant 0 : index
    %42 = vector.load %arg5[%c0_18, %c0_19] : memref<128x128xf32, #tpu.memory_space<vmem>>, vector<128x128xf32>
    %cst_20 = arith.constant dense<0.000000e+00> : vector<8x128xf32>
    %43 = tpu.matmul %41, %42, %cst_20 {dimension_numbers = #tpu.dot_dimension_numbers<[1], [0], [0], [1], [0, 0, 1, 1], [], []>} : vector<8x128xf32>, vector<128x128xf32>, vector<8x128xf32> -> vector<8x128xf32>
    %44 = vector.broadcast %5 : vector<1x128xf32> to vector<8x128xf32>
    %45 = arith.addf %43, %44 : vector<8x128xf32>
    %c0_21 = arith.constant 0 : index
    %c0_22 = arith.constant 0 : index
    %c0_23 = arith.constant 0 : index
    %46 = vector.load %arg7[%c0_21, %c0_22, %c0_23] : memref<1x8x128xf32, #tpu.memory_space<vmem>>, vector<1x8x128xf32>
    %47 = vector.shape_cast %46 : vector<1x8x128xf32> to vector<8x128xf32>
    %48 = vector.shape_cast %45 : vector<8x128xf32> to vector<1x8x128xf32>
    tpu.vector_store %arg7[%c0_21, %c0_22, %c0_23], %48 {strides = array<i32>} : memref<1x8x128xf32, #tpu.memory_space<vmem>>, vector<1x8x128xf32>,
    %c0_24 = arith.constant 0 : index
    %c0_25 = arith.constant 0 : index
    %49 = vector.load %arg8[%c0_24, %c0_25] : memref<8x128xf32, #tpu.memory_space<vmem>>, vector<8x128xf32>
    tpu.vector_store %arg8[%c0_24, %c0_25], %41 {strides = array<i32>} : memref<8x128xf32, #tpu.memory_space<vmem>>, vector<8x128xf32>,
    %c0_26 = arith.constant 0 : index
    %c0_27 = arith.constant 0 : index
    %50 = vector.load %arg9[%c0_26, %c0_27] : memref<8x128xf32, #tpu.memory_space<vmem>>, vector<8x128xf32>
    tpu.vector_store %arg9[%c0_26, %c0_27], %41 {strides = array<i32>} : memref<8x128xf32, #tpu.memory_space<vmem>>, vector<8x128xf32>,
    return
  }
  func.func @transform_0(%arg0: i32) -> (i32, i32, i32) {
    %c0_i32 = arith.constant 0 : i32
    %c0_i32_0 = arith.constant 0 : i32
    %c0_i32_1 = arith.constant 0 : i32
    return %arg0, %c0_i32, %c0_i32_0 : i32, i32, i32
  }
  func.func @transform_1(%arg0: i32) -> (i32, i32) {
    %c0_i32 = arith.constant 0 : i32
    %c0_i32_0 = arith.constant 0 : i32
    %c0_i32_1 = arith.constant 0 : i32
    return %c0_i32, %c0_i32_0 : i32, i32
  }
  func.func @transform_2(%arg0: i32) -> (i32, i32) {
    %c0_i32 = arith.constant 0 : i32
    %c0_i32_0 = arith.constant 0 : i32
    %c0_i32_1 = arith.constant 0 : i32
    return %c0_i32, %c0_i32_0 : i32, i32
  }
  func.func @transform_3(%arg0: i32) -> (i32, i32) {
    %c0_i32 = arith.constant 0 : i32
    %c0_i32_0 = arith.constant 0 : i32
    %c0_i32_1 = arith.constant 0 : i32
    return %c0_i32, %c0_i32_0 : i32, i32
  }
  func.func @transform_4(%arg0: i32) -> (i32, i32) {
    %c0_i32 = arith.constant 0 : i32
    %c0_i32_0 = arith.constant 0 : i32
    %c0_i32_1 = arith.constant 0 : i32
    return %c0_i32, %c0_i32_0 : i32, i32
  }
  func.func @transform_5(%arg0: i32) -> (i32, i32) {
    %c0_i32 = arith.constant 0 : i32
    %c0_i32_0 = arith.constant 0 : i32
    %c0_i32_1 = arith.constant 0 : i32
    return %c0_i32, %c0_i32_0 : i32, i32
  }
  func.func @transform_6(%arg0: i32) -> (i32, i32, i32) {
    %c0_i32 = arith.constant 0 : i32
    %c0_i32_0 = arith.constant 0 : i32
    %c0_i32_1 = arith.constant 0 : i32
    return %arg0, %c0_i32, %c0_i32_0 : i32, i32, i32
  }
  func.func @transform_7(%arg0: i32) -> (i32, i32) {
    %c0_i32 = arith.constant 0 : i32
    %c0_i32_0 = arith.constant 0 : i32
    %c0_i32_1 = arith.constant 0 : i32
    return %c0_i32, %c0_i32_0 : i32, i32
  }
}

</mosaic_0001>

<bundles_post_ra>
// kernel: tpu_custom_call.1
= control target key start
LH: loop header
LB: loop body
LE: loop exit
PB: predicated region body
PF: predicated region fallthrough
CT: control target
= control target key end

     0   :  { %s1652_s0 = inlined_call_operand.hbm [shape: f32[8,8,128], index: 0, kind: input, shape index: {}]   ;;  %s1653_s1 = inlined_call_operand.hbm [shape: f32[8,128], index: 1, kind: input, shape index: {}]   ;;  %s1654_s2 = inlined_call_operand.hbm [shape: f32[128,128], index: 2, kind: input, shape index: {}]   ;;  %s1655_s3 = inlined_call_operand.hbm [shape: f32[256,512], index: 3, kind: input, shape index: {}]   ;;  %s1656_s4 = inlined_call_operand.hbm [shape: f32[128,128], index: 4, kind: input, shape index: {}]   ;;  %s1657_s5 = inlined_call_operand.hbm [shape: f32[1,768], index: 5, kind: input, shape index: {}]   ;;  %s1658_s6 = inlined_call_operand.hbm [shape: f32[8,8,128], index: 6, kind: output, shape index: {0}]   ;;  %s1659_s7 = inlined_call_operand.hbm [shape: f32[8,128], index: 7, kind: output, shape index: {1}]  }
   0x1   :  { %1661 = sst [smem:[#allocation23_spill]] %s1653_s1 }
   0x2   :  { %13 = vsyncpa [#allocation4], 0 }
   0x3   :  { %15 = vsyncpa [#allocation4 + $0x1], 0 }
   0x4   :  { %16 = vsyncpa [#allocation7], 0 }
   0x5   :  { %17 = vsyncpa [#allocation10], 0 }
   0x6   :  { %18 = vsyncpa [#allocation13], 0 }
   0x7   :  { %19 = vsyncpa [#allocation5], 0 }
   0x8   :  { %21 = vsyncpa [#allocation5 + $0x1], 0 }
   0x9   :  { %22 = vsyncpa [#allocation16], 0  ;;  %s1456_s24 = smov 0   ;;  %s1458_s25 = smov 0  }
   0xa   :  { %s1460_s26 = smov 0   ;;  %s1462_s27 = smov 0  }
   0xb LB: > { %s1662_s1 = sld [smem:[#allocation23_spill]]  ;;  %s1480_s8 = sadd.s32 4294967295, %s1404_s27   ;;  %s1404_s27 = sphi %s1462_s27, %s1676_s27   ;;  %s1400_s26 = sphi %s1460_s26, %s1675_s26   ;;  %s1396_s25 = sphi %s1458_s25, %s1674_s25   ;;  %s1392_s24 = sphi %s1456_s24, %s1673_s24  }
   0xc   : > { %p968_p0 = scmp.ge.s32.totalorder %s1404_s27, 1  ;;  %p49_p1 = scmp.eq.s32.totalorder %s1480_s8, 0 }
   0xd   : > { %p211_p2 = scmp.lt.s32.totalorder %s1404_s27, 9  ;;  %s1406_s10 = smov [#allocation6]  }
   0xe   : > { %s225_s11 = sshll.u32 %s1406_s10, 4  ;;  %s248_s14 = sshll.u32 %s1655_s3, 4  ;;  %s226_s11 = int_to_ptr.vmem [resolvable:$true] %s225_s11  ;;  %s249_s14 = int_to_ptr.hbm [resolvable:$true] %s248_s14 }
   0xf   : > { %p1486_p4 = pnand %p968_p0, %p211_p2  ;;  %s1407_s16 = smov [#allocation9]  }
  0x10   : > { %s250_s17 = sshll.u32 %s1407_s16, 4  ;;  %s1408_s18 = smov 512   ;;  %s251_s17 = int_to_ptr.vmem [resolvable:$true] %s250_s17 }
  0x11   : > { %s223_s30 = sshll.u32 %s1662_s1, 4  ;;  %p1022_p5 = pneg %p1486_p4  ;;  %s224_s30 = int_to_ptr.hbm [resolvable:$true] %s223_s30 }
  0x12   : > { %s1409_s19 = smov 32   ;;  %s234_s22 = sshll.u32 %s1654_s2, 4  ;;  %s235_s22 = int_to_ptr.hbm [resolvable:$true] %s234_s22 }
  0x13   : > { %p1497_p6 = pnand %p1022_p5, %p49_p1  ;;  %s1410_s23 = smov [#allocation8]  }
  0x14   : > { %s236_s28 = sshll.u32 %s1410_s23, 4  ;;  %s262_s12 = sshll.u32 %s1656_s4, 4  ;;  %s237_s28 = int_to_ptr.vmem [resolvable:$true] %s236_s28  ;;  %s263_s12 = int_to_ptr.hbm [resolvable:$true] %s262_s12 }
  0x15   : > { %1025 = dma.hbm_to_vmem [thread:$0]  (!%p1497_p6), %s224_s30, 128, %s226_s11, [#allocation7]  }
  0x16   : > { %1031 = dma.hbm_to_vmem [thread:$0]  (!%p1497_p6), %s249_s14, 16384, %s251_s17, [#allocation10], %s1408_s18, %s1408_s18, %s1409_s19  }
  0x17   : > { %s1411_s30 = smov 128   ;;  %s1412_s11 = smov 8  }
  0x18   : > { %1028 = dma.hbm_to_vmem [thread:$0]  (!%p1497_p6), %s235_s22, 2048, %s237_s28, [#allocation7], %s1411_s30, %s1411_s30, %s1412_s11  }
  0x19   : > { %s1413_s13 = smov [#allocation11]   ;;  %s277_s18 = sshll.u32 %s1657_s5, 4  ;;  %s278_s18 = int_to_ptr.hbm [resolvable:$true] %s277_s18 }
  0x1a   : > { %s264_s14 = sshll.u32 %s1413_s13, 4  ;;  %s1414_s19 = smov [#allocation12]   ;;  %s265_s14 = int_to_ptr.vmem [resolvable:$true] %s264_s14 }
  0x1b   : > { %1034 = dma.hbm_to_vmem [thread:$0]  (!%p1497_p6), %s263_s12, 2048, %s265_s14, [#allocation10], %s1411_s30, %s1411_s30, %s1412_s11  }
  0x1c   : > { %s279_s20 = sshll.u32 %s1414_s19, 4  ;;  %s967_s21 = sadd.s32 4294967294, %s1404_s27   ;;  %s280_s20 = int_to_ptr.vmem [resolvable:$true] %s279_s20 }
  0x1d   : > { %1037 = dma.hbm_to_vmem [thread:$0]  (!%p1497_p6), %s278_s18, 96, %s280_s20, [#allocation13]  }
  0x1e   : > { %s1522_s22 = sadd.s32 1, %s1404_s27   ;;  %s35_s23 = sadd.s32 1, %s1400_s26 }
  0x1f   : > { %s32_s28 = ssub.s32 %s1404_s27, %s1522_s22  ;;  %p42_p7 = scmp.ne.s32.totalorder %s1400_s26, %s1396_s25 }
  0x20   : > { %p33_p8 = scmp.eq.s32.totalorder %s32_s28, 0  ;;  %p43_p9 = scmp.eq.s32.totalorder %s1404_s27, 0 }
  0x21   : > { %p48_p10 = scmp.ne.s32.totalorder %s1396_s25, %s1392_s24  ;;  %p1660_p11 = scmp.eq.s32.totalorder %s1480_s8, 7 }
  0x22   : > { %s1534_s29 = scalar_select %p33_p8, %s1400_s26, %s35_s23  }
  0x23   : > { %p1538_p12 = por %p49_p1, %p48_p10  ;;  %p1544_p13 = por %p1660_p11, %p42_p7 }
  0x24   : > { %p183_p0 = scmp.eq.s32.totalorder %s967_s21, 7  ;;  %p44_p2 = por %p43_p9, %p42_p7 }
  0x25   : > { %s290_s12 = sand.u32 1, %s1400_s26   ;;  %p1051_p6 = scmp.lt.s32.totalorder %s1404_s27, 8 }
  0x26   : > { %p1549_p5 = por %p183_p0, %p48_p10  ;;  %s975_s11 = sshll.u32 %s290_s12, 3 }
  0x27   : > { %s976_s13 = sshll.u32 %s1404_s27, 3  ;;  %s294_s19 = scalar_lea.vmem [#allocation3], %s975_s11 }
  0x28   : > { %s298_s17 = scalar_lea.hbm %s1652_s0, %s976_s13  ;;  %s302_s20 = sshll.u32 %s294_s19, 4  ;;  %s303_s20 = int_to_ptr.vmem [resolvable:$true] %s302_s20 }
  0x29   : > { %s300_s18 = sshll.u32 %s298_s17, 4  ;;  %p1558_p8 = pnand %p1051_p6, %p44_p2  ;;  %s301_s18 = int_to_ptr.hbm [resolvable:$true] %s300_s18 }
  0x2a   : > { %s291_s23 = scalar_lea.sflag [#allocation4], %s290_s12  ;;  %s1264_s28 = sshra.s32 %s301_s18, 4  ;;  %s1265_s28 = int_to_ptr.hbm [resolvable:$true] %s1264_s28 }
  0x2b   : > { %s1266_s1 = scalar_lea.hbm %s1265_s28, 8  ;;  %p1268_p9 = pneg %p1558_p8 }
  0x2c   : > { %p1267_p7 = scmp.ne.s32.totalorder %s1265_s28, %s1266_s1  ;;  %s1271_s11 = scalar_lea.hbm %s1652_s0, 64 }
  0x2d   : > { %p1272_p2 = scmp.lt.s32.totalorder %s1265_s28, %s1652_s0  ;;  %p1273_p6 = scmp.lt.s32.totalorder %s1271_s11, %s1266_s1 }
  0x2e   : > { %p1269_p10 = pnand %p1268_p9, %p1267_p7 }
  0x2f   : > { %p1274_p11 = por %p1273_p6, %p1272_p2 }
  0x30   : > { %p1270_p0 = pneg %p1269_p10 }
  0x32   : > { %p1275_p3 = pnand %p1274_p11, %p1270_p0 }
  0x34   : > { %1278 = shalt.err (!%p1275_p3)
}
  0x35   : > { %1041 = dma.hbm_to_vmem [thread:$0]  (!%p1558_p8), %s301_s18, 128, %s303_s20, %s291_s23  }
  0x36   : > { %311 = sbr.rel (%p1486_p4) target bundleno = 546 (0x222), region = 44  ;;  %s1575_s12 = sand.u32 (!%p1486_p4), 1, %s1396_s25  }
  0x37   : > { %s978_s19 = sshll.u32 (!%p1486_p4), %s1575_s12, 3  ;;  %s314_s13 = scalar_lea.sflag (!%p1486_p4), [#allocation4], %s1575_s12 }
  0x38   : > { %s1579_s14 = scalar_lea.vmem (!%p1486_p4), [#allocation3], %s978_s19 }
  0x3b   : > { %1367 = dma.done.wait (%p1538_p12), %s314_s13, 128  }
  0x3c   : > { %1369 = vsyncadd (%p1538_p12), %s314_s13, 4294967168 }
  0x3d   : > { %1371 = dma.done.wait (%p49_p1), [#allocation7], 2176  }
  0x3e   : > { %1373 = vsyncadd (%p49_p1), [#allocation7], 4294965120 }
  0x3f   : > { %1375 = dma.done.wait (%p49_p1), [#allocation10], 18432  }
  0x40   : > { %1377 = vsyncadd (%p49_p1), [#allocation10], 4294948864 }
  0x41   : > { %1379 = dma.done.wait (%p49_p1), [#allocation13], 96  }
  0x42   : > { %1381 = vsyncadd (%p49_p1), [#allocation13], 4294967200  ;;  %s1597_s1 = scalar_lea.vmem [#allocation14], %s978_s19  ;;  %p1669_p3 = scmp.ne.s32.totalorder %s1480_s8, 0 }
  0x44   : > { %377 = sbr.rel (%p1669_p3) target bundleno = 75 (0x4b), region = 72 }
  0x49   : > { %v378_v0 = vld [vmem:[#allocation6] sm:$0xff] }
  0x4a   : > { %379 = vst [vmem:[#allocation2] sm:$0xff] %v378_v0 }
  0x4b PF: > { %v400_v1 = vld [vmem:[#allocation8 + $0x78] sm:$0xff]  ;;  %v399_v2 = vld [vmem:[#allocation8 + $0x70] sm:$0xff]  ;;  %v398_v3 = vld [vmem:[#allocation8 + $0x68] sm:$0xff]  ;;  %s1415_s9 = smov [#allocation15]   ;;  %s836_s21 = sshll.u32 %s1659_s7, 4  ;;  %s837_s21 = int_to_ptr.hbm [resolvable:$true] %s836_s21 }
  0x4c   : > { %404 = vmatpush.msra.mxu0 %v400_v1  ;;  %v397_v4 = vld [vmem:[#allocation8 + $0x60] sm:$0xff]  ;;  %v396_v6 = vld [vmem:[#allocation8 + $0x58] sm:$0xff]  ;;  %v486_v10 = vld [vmem:[#allocation9 + $0x1e8] sm:$0xff]  ;;  %s834_s15 = sshll.u32 %s1415_s9, 4  ;;  %p1670_p1 = scmp.eq.s32.totalorder %s1480_s8, 7  ;;  %s835_s15 = int_to_ptr.vmem [resolvable:$true] %s834_s15 }
  0x4d   : > { %v549_v5 = vld [vmem:[#allocation9 + $0x3e0] sm:$0xff]  ;;  %v395_v12 = vld [vmem:[#allocation8 + $0x50] sm:$0xff]  ;;  %602 = vmatpush.msra.mxu3 %v486_v10  ;;  %v482_v13 = vld [vmem:[#allocation9 + $0x1c8] sm:$0xff]  ;;  %s989_s23 = sshll.u32 %s1480_s8, 3  ;;  %s822_s17 = sshll.u32 %s1597_s1, 4  ;;  %s823_s17 = int_to_ptr.vmem [resolvable:$true] %s822_s17 }
  0x4e   : > { %405 = vmatpush.msra.mxu0 %v399_v2  ;;  %582 = vmatpush.msra.mxu2 %v549_v5  ;;  %v545_v7 = vld [vmem:[#allocation9 + $0x3c0] sm:$0xff]  ;;  %v478_v16 = vld [vmem:[#allocation9 + $0x1a8] sm:$0xff]  ;;  %v392_v25 = vld [vmem:[#allocation8 + $0x38] sm:$0xff]  ;;  %s820_s16 = scalar_lea.hbm %s1658_s6, %s989_s23  ;;  %s810_s13 = scalar_lea.sflag [#allocation5], %s1575_s12 }
  0x4f   : > { %v485_v8 = vld [vmem:[#allocation9 + $0x1e0] sm:$0xff]  ;;  %v394_v17 = vld [vmem:[#allocation8 + $0x48] sm:$0xff]  ;;  %603 = vmatpush.msra.mxu3 %v482_v13  ;;  %v391_v29 = vld [vmem:[#allocation8 + $0x30] sm:$0xff]  ;;  %s824_s19 = sshll.u32 %s820_s16, 4  ;;  %s1342_s20 = scalar_lea.hbm %s1658_s6, 64  ;;  %s825_s19 = int_to_ptr.hbm [resolvable:$true] %s824_s19 }
  0x50   : > { %406 = vmatpush.msra.mxu0 %v398_v3  ;;  %562 = vmatpush.msra.mxu1 %v485_v8  ;;  %v541_v9 = vld [vmem:[#allocation9 + $0x3a0] sm:$0xff]  ;;  %v474_v20 = vld [vmem:[#allocation9 + $0x188] sm:$0xff]  ;;  %v388_v41 = vld [vmem:[#allocation8 + $0x18] sm:$0xff] }
  0x51   : > { %v481_v11 = vld [vmem:[#allocation9 + $0x1c0] sm:$0xff]  ;;  %583 = vmatpush.msra.mxu2 %v545_v7  ;;  %604 = vmatpush.msra.mxu3 %v478_v16  ;;  %v470_v24 = vld [vmem:[#allocation9 + $0x168] sm:$0xff]  ;;  %v387_v45 = vld [vmem:[#allocation8 + $0x10] sm:$0xff] }
  0x52   : > { %407 = vmatpush.msra.mxu0 %v397_v4  ;;  %v477_v14 = vld [vmem:[#allocation9 + $0x1a0] sm:$0xff]  ;;  %563 = vmatpush.msra.mxu1 %v481_v11  ;;  %v466_v28 = vld [vmem:[#allocation9 + $0x148] sm:$0xff]  ;;  %v551_v2 = vld [vmem:[#allocation9 + $0x3f0] sm:$0xff] }
  0x53   : > { %v537_v15 = vld [vmem:[#allocation9 + $0x380] sm:$0xff]  ;;  %584 = vmatpush.msra.mxu2 %v541_v9  ;;  %605 = vmatpush.msra.mxu3 %v474_v20  ;;  %v462_v32 = vld [vmem:[#allocation9 + $0x128] sm:$0xff]  ;;  %v487_v8 = vld [vmem:[#allocation9 + $0x1f0] sm:$0xff] }
  0x54   : > { %408 = vmatpush.msra.mxu0 %v396_v6  ;;  %v473_v18 = vld [vmem:[#allocation9 + $0x180] sm:$0xff]  ;;  %564 = vmatpush.msra.mxu1 %v477_v14  ;;  %v390_v33 = vld [vmem:[#allocation8 + $0x28] sm:$0xff]  ;;  %v547_v6 = vld [vmem:[#allocation9 + $0x3d0] sm:$0xff] }
  0x55   : > { %v533_v19 = vld [vmem:[#allocation9 + $0x360] sm:$0xff]  ;;  %585 = vmatpush.msra.mxu2 %v537_v15  ;;  %606 = vmatpush.msra.mxu3 %v470_v24  ;;  %v458_v36 = vld [vmem:[#allocation9 + $0x108] sm:$0xff]  ;;  %v543_v10 = vld [vmem:[#allocation9 + $0x3b0] sm:$0xff] }
  0x56   : > { %409 = vmatpush.msra.mxu0 %v395_v12  ;;  %v393_v21 = vld [vmem:[#allocation8 + $0x40] sm:$0xff]  ;;  %565 = vmatpush.msra.mxu1 %v473_v18  ;;  %v454_v40 = vld [vmem:[#allocation9 + $0xe8] sm:$0xff]  ;;  %v488_v11 = vld [vmem:[#allocation9 + $0x1f8] sm:$0xff] }
  0x57   : > { %v469_v22 = vld [vmem:[#allocation9 + $0x160] sm:$0xff]  ;;  %586 = vmatpush.msra.mxu2 %v533_v19  ;;  %607 = vmatpush.msra.mxu3 %v466_v28  ;;  %v450_v44 = vld [vmem:[#allocation9 + $0xc8] sm:$0xff]  ;;  %v483_v12 = vld [vmem:[#allocation9 + $0x1d0] sm:$0xff] }
  0x58   : > { %410 = vmatpush.msra.mxu0 %v394_v17  ;;  %v529_v23 = vld [vmem:[#allocation9 + $0x340] sm:$0xff]  ;;  %566 = vmatpush.msra.mxu1 %v469_v22  ;;  %v446_v48 = vld [vmem:[#allocation9 + $0xa8] sm:$0xff]  ;;  %v539_v14 = vld [vmem:[#allocation9 + $0x390] sm:$0xff] }
  0x59   : > { %v465_v26 = vld [vmem:[#allocation9 + $0x140] sm:$0xff]  ;;  %587 = vmatpush.msra.mxu2 %v529_v23  ;;  %608 = vmatpush.msra.mxu3 %v462_v32  ;;  %v386_v49 = vld [vmem:[#allocation8 + $0x8] sm:$0xff]  ;;  %v484_v15 = vld [vmem:[#allocation9 + $0x1d8] sm:$0xff] }
  0x5a   : > { %411 = vmatpush.msra.mxu0 %v393_v21  ;;  %v525_v27 = vld [vmem:[#allocation9 + $0x320] sm:$0xff]  ;;  %567 = vmatpush.msra.mxu1 %v465_v26  ;;  %v442_v52 = vld [vmem:[#allocation9 + $0x88] sm:$0xff]  ;;  %v479_v16 = vld [vmem:[#allocation9 + $0x1b0] sm:$0xff] }
  0x5b   : > { %v461_v30 = vld [vmem:[#allocation9 + $0x120] sm:$0xff]  ;;  %588 = vmatpush.msra.mxu2 %v525_v27  ;;  %609 = vmatpush.msra.mxu3 %v458_v36  ;;  %v383_v55 = vld [vmem:[%s1579_s14] sm:$0xff]  ;;  %v480_v19 = vld [vmem:[#allocation9 + $0x1b8] sm:$0xff]  ;;  %s1336_s14 = sshra.s32 %s825_s19, 4  ;;  %s1337_s14 = int_to_ptr.hbm [resolvable:$true] %s1336_s14 }
  0x5c   : > { %412 = vmatpush.msra.mxu0 %v392_v25  ;;  %v521_v31 = vld [vmem:[#allocation9 + $0x300] sm:$0xff]  ;;  %568 = vmatpush.msra.mxu1 %v461_v30  ;;  %v550_v57 = vld [vmem:[#allocation9 + $0x3e8] sm:$0xff]  ;;  %v535_v18 = vld [vmem:[#allocation9 + $0x370] sm:$0xff]  ;;  %s1338_s9 = scalar_lea.hbm %s1337_s14, 8  ;;  %p1343_p8 = scmp.lt.s32.totalorder %s1337_s14, %s1658_s6 }
  0x5d   : > { %v457_v34 = vld [vmem:[#allocation9 + $0x100] sm:$0xff]  ;;  %589 = vmatpush.msra.mxu2 %v521_v31  ;;  %610 = vmatpush.msra.mxu3 %v454_v40  ;;  %v438_v58 = vld [vmem:[#allocation9 + $0x68] sm:$0xff]  ;;  %v475_v20 = vld [vmem:[#allocation9 + $0x190] sm:$0xff]  ;;  %p1339_p4 = scmp.ne.s32.totalorder %s1337_s14, %s1338_s9  ;;  %p1344_p7 = scmp.lt.s32.totalorder %s1342_s20, %s1338_s9 }
  0x5e   : > { %413 = vmatpush.msra.mxu0 %v391_v29  ;;  %v517_v35 = vld [vmem:[#allocation9 + $0x2e0] sm:$0xff]  ;;  %569 = vmatpush.msra.mxu1 %v457_v34  ;;  %v546_v61 = vld [vmem:[#allocation9 + $0x3c8] sm:$0xff]  ;;  %v531_v22 = vld [vmem:[#allocation9 + $0x350] sm:$0xff] }
  0x5f   : > { %v389_v37 = vld [vmem:[#allocation8 + $0x20] sm:$0xff]  ;;  %590 = vmatpush.msra.mxu2 %v517_v35  ;;  %611 = vmatpush.msra.mxu3 %v450_v44  ;;  %v434_v62 = vld [vmem:[#allocation9 + $0x48] sm:$0xff]  ;;  %v476_v23 = vld [vmem:[#allocation9 + $0x198] sm:$0xff]  ;;  %p1340_p11 = pnand %p1339_p4, %p1544_p13  ;;  %p1345_p9 = por %p1344_p7, %p1343_p8 }
  0x60   : > { %v453_v38 = vld [vmem:[#allocation9 + $0xe0] sm:$0xff]  ;;  %414 = vmatpush.msra.mxu0 %v390_v33  ;;  %v542_v1 = vld [vmem:[#allocation9 + $0x3a8] sm:$0xff]  ;;  %v471_v24 = vld [vmem:[#allocation9 + $0x170] sm:$0xff] }
  0x61   : > { %v513_v39 = vld [vmem:[#allocation9 + $0x2c0] sm:$0xff]  ;;  %570 = vmatpush.msra.mxu1 %v453_v38  ;;  %612 = vmatpush.msra.mxu3 %v446_v48  ;;  %v430_v3 = vld [vmem:[#allocation9 + $0x28] sm:$0xff]  ;;  %v527_v26 = vld [vmem:[#allocation9 + $0x330] sm:$0xff]  ;;  %p1341_p12 = pneg %p1340_p11 }
  0x62   : > { %v449_v42 = vld [vmem:[#allocation9 + $0xc0] sm:$0xff]  ;;  %415 = vmatpush.msra.mxu0 %v389_v37  ;;  %591 = vmatpush.msra.mxu2 %v513_v39  ;;  %v538_v5 = vld [vmem:[#allocation9 + $0x388] sm:$0xff]  ;;  %v472_v27 = vld [vmem:[#allocation9 + $0x178] sm:$0xff] }
  0x63   : > { %v509_v43 = vld [vmem:[#allocation9 + $0x2a0] sm:$0xff]  ;;  %571 = vmatpush.msra.mxu1 %v449_v42  ;;  %613 = vmatpush.msra.mxu3 %v442_v52  ;;  %v426_v7 = vld [vmem:[#allocation9 + $0x8] sm:$0xff]  ;;  %v467_v28 = vld [vmem:[#allocation9 + $0x150] sm:$0xff]  ;;  %p1346_p10 = pnand %p1345_p9, %p1341_p12 }
  0x64   : > { %v445_v46 = vld [vmem:[#allocation9 + $0xa0] sm:$0xff]  ;;  %416 = vmatpush.msra.mxu0 %v388_v41  ;;  %592 = vmatpush.msra.mxu2 %v509_v43  ;;  %v534_v9 = vld [vmem:[#allocation9 + $0x368] sm:$0xff]  ;;  %v523_v30 = vld [vmem:[#allocation9 + $0x310] sm:$0xff] }
  0x65   : > { %v505_v47 = vld [vmem:[#allocation9 + $0x280] sm:$0xff]  ;;  %572 = vmatpush.msra.mxu1 %v445_v46  ;;  %614 = vmatpush.msra.mxu3 %v438_v58  ;;  %v530_v13 = vld [vmem:[#allocation9 + $0x348] sm:$0xff]  ;;  %v468_v31 = vld [vmem:[#allocation9 + $0x158] sm:$0xff] }
  0x66   : > { %v441_v50 = vld [vmem:[#allocation9 + $0x80] sm:$0xff]  ;;  %417 = vmatpush.msra.mxu0 %v387_v45  ;;  %593 = vmatpush.msra.mxu2 %v505_v47  ;;  %v526_v17 = vld [vmem:[#allocation9 + $0x328] sm:$0xff]  ;;  %v463_v32 = vld [vmem:[#allocation9 + $0x130] sm:$0xff] }
  0x67   : > { %v501_v51 = vld [vmem:[#allocation9 + $0x260] sm:$0xff]  ;;  %573 = vmatpush.msra.mxu1 %v441_v50  ;;  %615 = vmatpush.msra.mxu3 %v434_v62  ;;  %v522_v21 = vld [vmem:[#allocation9 + $0x308] sm:$0xff]  ;;  %v519_v34 = vld [vmem:[#allocation9 + $0x2f0] sm:$0xff] }
  0x68   : > { %v385_v53 = vld [vmem:[#allocation8] sm:$0xff]  ;;  %418 = vmatpush.msra.mxu0 %v386_v49  ;;  %594 = vmatpush.msra.mxu2 %v501_v51  ;;  %v518_v25 = vld [vmem:[#allocation9 + $0x2e8] sm:$0xff]  ;;  %v464_v35 = vld [vmem:[#allocation9 + $0x138] sm:$0xff] }
  0x69   : > { %v437_v54 = vld [vmem:[#allocation9 + $0x60] sm:$0xff]  ;;  %616 = vmatpush.msra.mxu3 %v430_v3  ;;  %v514_v29 = vld [vmem:[#allocation9 + $0x2c8] sm:$0xff]  ;;  %v459_v36 = vld [vmem:[#allocation9 + $0x110] sm:$0xff] }
  0x6a   : > { %v497_v56 = vld [vmem:[#allocation9 + $0x240] sm:$0xff]  ;;  %419 = vmatpush.msra.mxu0 %v385_v53  ;;  %574 = vmatpush.msra.mxu1 %v437_v54  ;;  %v510_v33 = vld [vmem:[#allocation9 + $0x2a8] sm:$0xff]  ;;  %v515_v38 = vld [vmem:[#allocation9 + $0x2d0] sm:$0xff] }
  0x6b   : > { %v493_v59 = vld [vmem:[#allocation9 + $0x220] sm:$0xff]  ;;  %420 = vmatmul.f32.vlgmr.msra.gmra.mxu0 %v383_v55  ;;  %595 = vmatpush.msra.mxu2 %v497_v56  ;;  %v506_v37 = vld [vmem:[#allocation9 + $0x288] sm:$0xff]  ;;  %v460_v39 = vld [vmem:[#allocation9 + $0x118] sm:$0xff] }
  0x6c   : > { %v433_v60 = vld [vmem:[#allocation9 + $0x40] sm:$0xff]  ;;  %622 = vmatpush.msrb.mxu0 %v550_v57  ;;  %617 = vmatpush.msra.mxu3 %v426_v7  ;;  %v455_v40 = vld [vmem:[#allocation9 + $0xf0] sm:$0xff]  ;;  %v502_v41 = vld [vmem:[#allocation9 + $0x268] sm:$0xff] }
  0x6d   : > { %v489_v63 = vld [vmem:[#allocation9 + $0x200] sm:$0xff]  ;;  %596 = vmatpush.msra.mxu2 %v493_v59  ;;  %575 = vmatpush.msra.mxu1 %v433_v60  ;;  %v511_v42 = vld [vmem:[#allocation9 + $0x2b0] sm:$0xff]  ;;  %v456_v43 = vld [vmem:[#allocation9 + $0xf8] sm:$0xff] }
  0x6e   : > { %v429_v0 = vld [vmem:[#allocation9 + $0x20] sm:$0xff]  ;;  %623 = vmatpush.msrb.mxu0 %v546_v61  ;;  %682 = vmatpush.msrb.mxu3 %v488_v11  ;;  %v498_v44 = vld [vmem:[#allocation9 + $0x248] sm:$0xff]  ;;  %v552_v47 = vld [vmem:[#allocation9 + $0x3f8] sm:$0xff] }
  0x6f   : > { %v425_v4 = vld [vmem:[#allocation9] sm:$0xff]  ;;  %597 = vmatpush.msra.mxu2 %v489_v63  ;;  %576 = vmatpush.msra.mxu1 %v429_v0  ;;  %v494_v45 = vld [vmem:[#allocation9 + $0x228] sm:$0xff]  ;;  %v548_v48 = vld [vmem:[#allocation9 + $0x3d8] sm:$0xff] }
  0x70   : > { %624 = vmatpush.msrb.mxu0 %v542_v1  ;;  %683 = vmatpush.msrb.mxu3 %v484_v15  ;;  %v490_v46 = vld [vmem:[#allocation9 + $0x208] sm:$0xff]  ;;  %v544_v49 = vld [vmem:[#allocation9 + $0x3b8] sm:$0xff]  ;;  %v451_v52 = vld [vmem:[#allocation9 + $0xd0] sm:$0xff] }
  0x71   : > { %662 = vmatpush.msrb.mxu2 %v551_v2  ;;  %577 = vmatpush.msra.mxu1 %v425_v4  ;;  %v540_v50 = vld [vmem:[#allocation9 + $0x398] sm:$0xff]  ;;  %v507_v53 = vld [vmem:[#allocation9 + $0x290] sm:$0xff]  ;;  %v1602_v56 = vld [vmem:[#allocation2] sm:$0xff] }
  0x72   : > { %625 = vmatpush.msrb.mxu0 %v538_v5  ;;  %684 = vmatpush.msrb.mxu3 %v480_v19  ;;  %v536_v51 = vld [vmem:[#allocation9 + $0x378] sm:$0xff]  ;;  %v447_v57 = vld [vmem:[#allocation9 + $0xb0] sm:$0xff]  ;;  %v1102_v19 = vld [vmem:[#allocation12] ss:$0 sm:$0xff] }
  0x73   : > { %663 = vmatpush.msrb.mxu2 %v547_v6  ;;  %642 = vmatpush.msrb.mxu1 %v487_v8  ;;  %v452_v54 = vld [vmem:[#allocation9 + $0xd8] sm:$0xff]  ;;  %v503_v58 = vld [vmem:[#allocation9 + $0x270] sm:$0xff] }
  0x74   : > { %626 = vmatpush.msrb.mxu0 %v534_v9  ;;  %685 = vmatpush.msrb.mxu3 %v476_v23  ;;  %v532_v55 = vld [vmem:[#allocation9 + $0x358] sm:$0xff]  ;;  %v443_v61 = vld [vmem:[#allocation9 + $0x90] sm:$0xff] }
  0x75   : > { %664 = vmatpush.msrb.mxu2 %v543_v10  ;;  %643 = vmatpush.msrb.mxu1 %v483_v12  ;;  %v448_v59 = vld [vmem:[#allocation9 + $0xb8] sm:$0xff]  ;;  %v499_v62 = vld [vmem:[#allocation9 + $0x250] sm:$0xff] }
  0x76   : > { %627 = vmatpush.msrb.mxu0 %v530_v13  ;;  %686 = vmatpush.msrb.mxu3 %v472_v27  ;;  %v528_v60 = vld [vmem:[#allocation9 + $0x338] sm:$0xff]  ;;  %v439_v1 = vld [vmem:[#allocation9 + $0x70] sm:$0xff] }
  0x77   : > { %665 = vmatpush.msrb.mxu2 %v539_v14  ;;  %644 = vmatpush.msrb.mxu1 %v479_v16  ;;  %v444_v63 = vld [vmem:[#allocation9 + $0x98] sm:$0xff]  ;;  %v495_v2 = vld [vmem:[#allocation9 + $0x230] sm:$0xff] }
  0x78   : > { %628 = vmatpush.msrb.mxu0 %v526_v17  ;;  %687 = vmatpush.msrb.mxu3 %v468_v31  ;;  %v524_v0 = vld [vmem:[#allocation9 + $0x318] sm:$0xff]  ;;  %v435_v5 = vld [vmem:[#allocation9 + $0x50] sm:$0xff] }
  0x79   : > { %666 = vmatpush.msrb.mxu2 %v535_v18  ;;  %645 = vmatpush.msrb.mxu1 %v475_v20  ;;  %v440_v3 = vld [vmem:[#allocation9 + $0x78] sm:$0xff]  ;;  %v491_v6 = vld [vmem:[#allocation9 + $0x210] sm:$0xff] }
  0x7a   : > { %629 = vmatpush.msrb.mxu0 %v522_v21  ;;  %688 = vmatpush.msrb.mxu3 %v464_v35  ;;  %v520_v4 = vld [vmem:[#allocation9 + $0x2f8] sm:$0xff]  ;;  %v431_v9 = vld [vmem:[#allocation9 + $0x30] sm:$0xff] }
  0x7b   : > { %667 = vmatpush.msrb.mxu2 %v531_v22  ;;  %646 = vmatpush.msrb.mxu1 %v471_v24  ;;  %v436_v7 = vld [vmem:[#allocation9 + $0x58] sm:$0xff]  ;;  %v427_v12 = vld [vmem:[#allocation9 + $0x10] sm:$0xff] }
  0x7c   : > { %630 = vmatpush.msrb.mxu0 %v518_v25  ;;  %689 = vmatpush.msrb.mxu3 %v460_v39  ;;  %v516_v8 = vld [vmem:[#allocation9 + $0x2d8] sm:$0xff]  ;;  %v781_v24 = vld [vmem:[#allocation11 + $0x70] sm:$0xff]  ;;  %v780_v25 = vld [vmem:[#allocation11 + $0x68] sm:$0xff] }
  0x7d   : > { %668 = vmatpush.msrb.mxu2 %v527_v26  ;;  %647 = vmatpush.msrb.mxu1 %v467_v28  ;;  %v432_v10 = vld [vmem:[#allocation9 + $0x38] sm:$0xff]  ;;  %v779_v26 = vld [vmem:[#allocation11 + $0x60] sm:$0xff] }
  0x7e   : > { %631 = vmatpush.msrb.mxu0 %v514_v29  ;;  %690 = vmatpush.msrb.mxu3 %v456_v43  ;;  %v512_v11 = vld [vmem:[#allocation9 + $0x2b8] sm:$0xff]  ;;  %v381_v28 = vld [vmem:[#allocation12 + $0x1] sm:$0xf]  ;;  %v777_v29 = vld [vmem:[#allocation11 + $0x50] sm:$0xff] }
  0x7f   : > { %669 = vmatpush.msrb.mxu2 %v523_v30  ;;  %648 = vmatpush.msrb.mxu1 %v463_v32  ;;  %v428_v13 = vld [vmem:[#allocation9 + $0x18] sm:$0xff]  ;;  %v776_v30 = vld [vmem:[#allocation11 + $0x48] sm:$0xff]  ;;  %v554_v31 = vperm.slane %v381_v28, 0  ;;  %v775_v32 = vld [vmem:[#allocation11 + $0x40] sm:$0xff]  ;;  %v555_v39 = vperm.slane %v381_v28, 1 }
  0x80   : > { %632 = vmatpush.msrb.mxu0 %v510_v33  ;;  %691 = vmatpush.msrb.mxu3 %v452_v54  ;;  %v508_v14 = vld [vmem:[#allocation9 + $0x298] sm:$0xff] }
  0x81   : > { %670 = vmatpush.msrb.mxu2 %v519_v34  ;;  %649 = vmatpush.msrb.mxu1 %v459_v36  ;;  %v504_v15 = vld [vmem:[#allocation9 + $0x278] sm:$0xff] }
  0x82   : > { %633 = vmatpush.msrb.mxu0 %v506_v37  ;;  %598 = vmatmul.f32.vlgmr.msra.gmra.mxu2 %v1602_v56  ;;  %v500_v16 = vld [vmem:[#allocation9 + $0x258] sm:$0xff]  ;;  %v773_v37 = vld [vmem:[#allocation11 + $0x30] sm:$0xff] }
  0x83   : > { %671 = vmatpush.msrb.mxu2 %v515_v38  ;;  %650 = vmatpush.msrb.mxu1 %v455_v40  ;;  %v496_v17 = vld [vmem:[#allocation9 + $0x238] sm:$0xff]  ;;  %v772_v40 = vld [vmem:[#allocation11 + $0x28] sm:$0xff] }
  0x84   : > { %634 = vmatpush.msrb.mxu0 %v502_v41  ;;  %692 = vmatpush.msrb.mxu3 %v448_v59  ;;  %v492_v18 = vld [vmem:[#allocation9 + $0x218] sm:$0xff] }
  0x85   : > { %672 = vmatpush.msrb.mxu2 %v511_v42  ;;  %651 = vmatpush.msrb.mxu1 %v451_v52  ;;  %v782_v23 = vld [vmem:[#allocation11 + $0x78] sm:$0xff]  ;;  %v771_v42 = vld [vmem:[#allocation11 + $0x20] sm:$0xff] }
  0x86   : > { %635 = vmatpush.msrb.mxu0 %v498_v44  ;;  %693 = vmatpush.msrb.mxu3 %v444_v63  ;;  %v778_v27 = vld [vmem:[#allocation11 + $0x58] sm:$0xff] }
  0x87   : > { %673 = vmatpush.msrb.mxu2 %v507_v53  ;;  %652 = vmatpush.msrb.mxu1 %v447_v57  ;;  %v774_v35 = vld [vmem:[#allocation11 + $0x38] sm:$0xff] }
  0x88   : > { %636 = vmatpush.msrb.mxu0 %v494_v45  ;;  %694 = vmatpush.msrb.mxu3 %v440_v3  ;;  %v770_v45 = vld [vmem:[#allocation11 + $0x18] sm:$0xff] }
  0x89   : > { %674 = vmatpush.msrb.mxu2 %v503_v58  ;;  %653 = vmatpush.msrb.mxu1 %v443_v61  ;;  %v557_v58 = vperm.slane %v381_v28, 3 }
  0x8a   : > { %637 = vmatpush.msrb.mxu0 %v490_v46  ;;  %695 = vmatpush.msrb.mxu3 %v436_v7 }
  0x8b   : > { %675 = vmatpush.msrb.mxu2 %v499_v62  ;;  %654 = vmatpush.msrb.mxu1 %v439_v1 }
  0x8c   : > { %702 = vmatpush.msra.mxu0 %v552_v47  ;;  %696 = vmatpush.msrb.mxu3 %v432_v10  ;;  %v769_v47 = vld [vmem:[#allocation11 + $0x10] sm:$0xff] }
  0x8d   : > { %676 = vmatpush.msrb.mxu2 %v495_v2  ;;  %655 = vmatpush.msrb.mxu1 %v435_v5 }
  0x8e   : > { %703 = vmatpush.msra.mxu0 %v548_v48  ;;  %697 = vmatpush.msrb.mxu3 %v428_v13 }
  0x8f   : > { %677 = vmatpush.msrb.mxu2 %v491_v6  ;;  %656 = vmatpush.msrb.mxu1 %v431_v9 }
  0x90   : > { %704 = vmatpush.msra.mxu0 %v544_v49  ;;  %678 = vmatmul.f32.vlgmr.msrb.gmra.mxu2 %v1602_v56  ;;  %v768_v49 = vld [vmem:[#allocation11 + $0x8] sm:$0xff] }
  0x91   : > { %657 = vmatpush.msrb.mxu1 %v427_v12  ;;  %638 = vmatmul.f32.vlgmr.msrb.gmra.mxu0 %v1602_v56 }
  0x92   : > { %705 = vmatpush.msra.mxu0 %v540_v50 }
  0x94   : > { %706 = vmatpush.msra.mxu0 %v536_v51  ;;  %v767_v51 = vld [vmem:[#allocation11] sm:$0xff] }
  0x96   : > { %707 = vmatpush.msra.mxu0 %v532_v55 }
  0x98   : > { %708 = vmatpush.msra.mxu0 %v528_v60  ;;  %v556_v60 = vperm.slane %v381_v28, 2 }
  0x9a   : > { %709 = vmatpush.msra.mxu0 %v524_v0 }
  0x9c   : > { %710 = vmatpush.msra.mxu0 %v520_v4 }
  0x9e   : > { %711 = vmatpush.msra.mxu0 %v516_v8 }
  0xa0   : > { %712 = vmatpush.msra.mxu0 %v512_v11 }
  0xa2   : > { %713 = vmatpush.msra.mxu0 %v508_v14 }
  0xa4   : > { %714 = vmatpush.msra.mxu0 %v504_v15 }
  0xa6   : > { %715 = vmatpush.msra.mxu0 %v500_v16 }
  0xa8   : > { %716 = vmatpush.msra.mxu0 %v496_v17 }
  0xaa   : > { %717 = vmatpush.msra.mxu0 %v492_v18 }
  0xab   : > { %718 = vmatmul.f32.vlgmr.msra.gmra.mxu0 %v1602_v56 }
  0xe8   : > { %v421_v20 = vpop.f32.mrf.mxu0 }
  0xe9   : > { %v422_v21 = vadd.f32 %v1102_v19, %v421_v20 }
  0xeb   : > { %v424_v22 = vmax.f32 %v422_v21, 0.0 }
  0xed   : > { %578 = vmatmul.f32.vlgmr.msra.gmra.mxu1 %v424_v22  ;;  %618 = vmatmul.f32.vlgmr.msra.gmra.mxu3 %v424_v22 }
  0xee   : > { %786 = vmatpush.msra.mxu1 %v782_v23 }
  0xf0   : > { %787 = vmatpush.msra.mxu1 %v781_v24 }
  0xf2   : > { %788 = vmatpush.msra.mxu1 %v780_v25 }
  0xf4   : > { %789 = vmatpush.msra.mxu1 %v779_v26 }
  0xf5   : > { %658 = vmatmul.f32.vlgmr.msrb.gmra.mxu1 %v424_v22  ;;  %698 = vmatmul.f32.vlgmr.msrb.gmra.mxu3 %v424_v22 }
  0xf6   : > { %790 = vmatpush.msra.mxu1 %v778_v27 }
  0xf8   : > { %791 = vmatpush.msra.mxu1 %v777_v29 }
  0xfa   : > { %792 = vmatpush.msra.mxu1 %v776_v30 }
  0xfc   : > { %793 = vmatpush.msra.mxu1 %v775_v32 }
  0xfe   : > { %794 = vmatpush.msra.mxu1 %v774_v35 }
 0x100   : > { %795 = vmatpush.msra.mxu1 %v773_v37 }
 0x102   : > { %796 = vmatpush.msra.mxu1 %v772_v40 }
 0x104   : > { %797 = vmatpush.msra.mxu1 %v771_v42 }
 0x105   : > { %v599_v34 = vpop.f32.mrf.mxu2 }
 0x106   : > { %798 = vmatpush.msra.mxu1 %v770_v45 }
 0x108   : > { %799 = vmatpush.msra.mxu1 %v769_v47 }
 0x10a   : > { %800 = vmatpush.msra.mxu1 %v768_v49 }
 0x10c   : > { %801 = vmatpush.msra.mxu1 %v767_v51 }
 0x10e   : > { %v639_v44 = vpop.f32.mrf.mxu0 }
 0x113   : > { %v679_v8 = vpop.f32.mrf.mxu2 }
 0x128   : > { %v719_v6 = vpop.f32.mrf.mxu0 }
 0x16a   : > { %v579_v33 = vpop.f32.mrf.mxu1 }
 0x16b   : > { %v580_v36 = vadd.f32 %v579_v33, %v554_v31 }
 0x16d   : > { %v600_v38 = vadd.f32 %v599_v34, %v580_v36 }
 0x16f   : > { %v986_v41 = vmul.f32 -1.442695, %v600_v38 }
 0x170   : > { %v619_v43 = vpop.f32.mrf.mxu3 }
 0x171   : > { %1104 = vpow2.f32 %v986_v41  ;;  %v620_v46 = vadd.f32 %v619_v43, %v555_v39 }
 0x172   : > { %v659_v62 = vpop.f32.mrf.mxu1 }
 0x173   : > { %v640_v48 = vadd.f32 %v639_v44, %v620_v46  ;;  %v660_v5 = vadd.f32 %v659_v62, %v556_v60 }
 0x175   : > { %v987_v50 = vmul.f32 -1.442695, %v640_v48  ;;  %v680_v14 = vadd.f32 %v679_v8, %v660_v5 }
 0x177   : > { %v1105_v52 = vpop.eup %1104  ;;  %1106 = vpow2.f32 %v987_v50 }
 0x178   : > { %v725_v53 = vadd.f32 1.0, %v1105_v52  ;;  %v699_v61 = vpop.f32.mrf.mxu3 }
 0x179   : > { %v700_v1 = vadd.f32 %v699_v61, %v557_v58 }
 0x17a   : > { %1108 = vrcp.f32 %v725_v53  ;;  %v737_v0 = vand.u32 2147483648, %v725_v53  ;;  %v735_v3 = vand.u32 2147483647, %v725_v53  ;;  %vm731_vm1 = vweird.f32 %v725_v53 }
 0x17b   : > { %v720_v12 = vadd.f32 %v719_v6, %v700_v1 }
 0x17c   : > { %v738_v10 = vor.u32 1.1754944e-38, %v737_v0  ;;  %vm736_vm3 = vcmp.eq.f32.partialorder %v735_v3, 8.507059e+37 }
 0x17d   : > { %v1107_v54 = vpop.eup %1106 }
 0x17e   : > { %v744_v55 = vadd.f32 1.0, %v1107_v54 }
 0x180   : > { %v1109_v57 = vpop.eup %1108  ;;  %1110 = vrcp.f32 %v744_v55  ;;  %v756_v18 = vand.u32 2147483648, %v744_v55  ;;  %v754_v19 = vand.u32 2147483647, %v744_v55  ;;  %vm750_vm5 = vweird.f32 %v744_v55 }
 0x181   : > { %v727_v59 = vmul.f32 %v1109_v57, %v725_v53  ;;  %vm732_vm0 = vweird.f32 %v1109_v57 }
 0x182   : > { %vm733_vm2 = vmor %vm731_vm1, %vm732_vm0  ;;  %v757_v23 = vor.u32 1.1754944e-38, %v756_v18  ;;  %vm755_vm7 = vcmp.eq.f32.partialorder %v754_v19, 8.507059e+37 }
 0x183   : > { %v728_v63 = vsub.f32 1.0, %v727_v59 }
 0x185   : > { %v729_v2 = vmul.f32 %v1109_v57, %v728_v63 }
 0x186   : > { %v1111_v4 = vpop.eup %1110 }
 0x187   : > { %v746_v7 = vmul.f32 %v1111_v4, %v744_v55  ;;  %v730_v9 = vadd.f32 %v1109_v57, %v729_v2  ;;  %vm751_vm4 = vweird.f32 %v1111_v4 }
 0x188   : > { %vm752_vm6 = vmor %vm750_vm5, %vm751_vm4 }
 0x189   : > { %v747_v11 = vsub.f32 1.0, %v746_v7  ;;  %v734_v13 = vsel %vm733_vm2, %v1109_v57, %v730_v9 }
 0x18a   : > { %v739_v15 = vsel %vm736_vm3, %v738_v10, %v734_v13 }
 0x18b   : > { %v748_v16 = vmul.f32 %v1111_v4, %v747_v11  ;;  %v760_v17 = vmul.f32 %v739_v15, %v720_v12 }
 0x18d   : > { %v761_v20 = vadd.f32 %v760_v17, %v680_v14  ;;  %v749_v21 = vadd.f32 %v1111_v4, %v748_v16 }
 0x18f   : > { %1112 = vtanh.f32 %v761_v20  ;;  %v753_v22 = vsel %vm752_vm6, %v1111_v4, %v749_v21 }
 0x190   : > { %v758_v24 = vsel %vm755_vm7, %v757_v23, %v753_v22 }
 0x191   : > { %v763_v25 = vsub.f32 1.0, %v758_v24  ;;  %v765_v28 = vmul.f32 %v758_v24, %v1602_v56  ;;  %v1103_v56 = vld [vmem:[#allocation12 + $0x5] ss:$0 sm:$0xff] }
 0x195   : > { %v1113_v26 = vpop.eup %1112 }
 0x196   : > { %v764_v27 = vmul.f32 %v1113_v26, %v763_v25 }
 0x198   : > { %v766_v29 = vadd.f32 %v765_v28, %v764_v27 }
 0x19a   : > { %802 = vmatmul.f32.vlgmr.msra.gmra.mxu1 %v766_v29  ;;  %808 = vst [vmem:[#allocation2] sm:$0xff] %v766_v29 }
 0x19b   : > { %807 = vst [vmem:[#allocation15] sm:$0xff] %v766_v29 }
 0x19c   : > { %1018 = dma.vmem_to_hbm [thread:$0]  (%p1670_p1), %s835_s15, 128, %s837_s21, [#allocation16]  }
 0x217   : > { %v803_v30 = vpop.f32.mrf.mxu1 }
 0x218   : > { %v804_v31 = vadd.f32 %v1103_v56, %v803_v30 }
 0x21a   : > { %806 = vst [vmem:[%s1597_s1] sm:$0xff] %v804_v31 }
 0x21b   : > { %1349 = shalt.err (!%p1346_p10)
}
 0x21c   : > { %1016 = dma.vmem_to_hbm [thread:$0]  (%p1544_p13), %s823_s17, 128, %s825_s19, %s810_s13  }
 0x21d   : > { %p1671_p0 = pmov %p1670_p1 }
 0x21f   : > { %1383 = dma.done.wait (%p1671_p0), [#allocation16], 128   ;;  %p1672_p2 = pmov %p1671_p0 }
 0x221   : > { %1385 = vsyncadd (%p1672_p2), [#allocation16], 4294967168 }
 0x222 PF: > { %p1059_p6 = scmp.ge.s32.totalorder %s1404_s27, 2  ;;  %s853_s12 = sand.u32 1, %s1392_s24  }
 0x223   : > { %s854_s1 = scalar_lea.sflag [#allocation5], %s853_s12 }
 0x224   : > { %p1043_p3 = pnand %p1059_p6, %p1549_p5 }
 0x226   : > { %p1044_p1 = pneg %p1043_p3 }
 0x228   : > { %1387 = dma.done.wait (%p1044_p1), %s854_s1, 128  }
 0x229   : > { %1389 = vsyncadd (%p1044_p1), %s854_s1, 4294967168  ;;  %p25_p13 = scmp.ge.s32.totalorder %s1522_s22, 10   ;;  %s1673_s24 = smov %s1396_s25 }
 0x22a   : > { %s1674_s25 = smov %s1400_s26  ;;  %s1675_s26 = smov %s1534_s29 }
 0x22b   : > { %s1676_s27 = smov %s1522_s22  ;;  %27 = sbr.rel (!%p25_p13) target bundleno = 11 (0xb), region = 121 }
 0x230   :  { %860 = vsyncpa [#allocation4], 1 }
 0x231   :  { %862 = vsyncpa [#allocation4 + $0x1], 1 }
 0x232   :  { %863 = vsyncpa [#allocation7], 1 }
 0x233   :  { %864 = vsyncpa [#allocation10], 1 }
 0x234   :  { %865 = vsyncpa [#allocation13], 1 }
 0x235   :  { %866 = vsyncpa [#allocation5], 1 }
 0x236   :  { %868 = vsyncpa [#allocation5 + $0x1], 1 }
 0x237   :  { %869 = vsyncpa [#allocation16], 1 }

</bundles_post_ra>
